<compile_context>
chip_gen: v6e
topology: v6e:2x2x1
jax: 0.10.0
libtpu: 0.0.40
codegen_flags: <defaults>
</compile_context>

<pallas_src>
import functools

import jax
import jax.numpy as jnp
from jax.experimental import pallas as pl
from jax.experimental.pallas import tpu as pltpu


def _conv_bn_relu_kernel(w_ref, p_ref, g_ref, b_ref, o_ref,
                         conv_ref, sum_ref, ssq_ref,
                         *, eps, inv_m, n_tiles, tm):
    i = pl.program_id(0)

    @pl.when(i == 0)
    def _init():
        sum_ref[...] = jnp.zeros_like(sum_ref)
        ssq_ref[...] = jnp.zeros_like(ssq_ref)

    # Single MXU matmul per tile: (Cout_p, K_p) x (K_p, tm) -> (Cout_p, tm), f32 acc.
    acc = jnp.dot(w_ref[...], p_ref[...], preferred_element_type=jnp.float32)

    # Spill the pre-BN conv tile to VMEM scratch and accumulate the per-channel
    # batch statistics in the same pass (acc is read exactly once per tile).
    conv_ref[i] = acc
    sum_ref[...] += jnp.sum(acc, axis=1, keepdims=True)
    ssq_ref[...] += jnp.sum(acc * acc, axis=1, keepdims=True)

    @pl.when(i == n_tiles - 1)
    def _finalize():
        mean = sum_ref[...] * inv_m                                   # (Cout_p, 1)
        var = jnp.maximum(ssq_ref[...] * inv_m - mean * mean, 0.0)    # biased var
        scale = g_ref[...] * jax.lax.rsqrt(var + eps)                 # EUP rsqrt
        shift = b_ref[...] - mean * scale
        for j in range(n_tiles):  # static unroll; aligned, lane-dense bf16 stores
            o_ref[:, j * tm:(j + 1) * tm] = jnp.maximum(
                conv_ref[j] * scale + shift, 0.0).astype(o_ref.dtype)


def conv_bn_relu(x_nchw, weight, bias, gamma, beta, *, stride, padding,
                 eps=1e-5, tm=256):
    """x_nchw: (N, Cin, H, W). weight: (Cout, Cin, KH, KW) (PyTorch layouts)."""
    del bias  # Mathematically cancelled by the BN mean subtraction after the conv.

    N, Cin, H, W = x_nchw.shape
    Cout, _, KH, KW = weight.shape
    H_out = (H + 2 * padding - KH) // stride + 1
    W_out = (W + 2 * padding - KW) // stride + 1
    M = N * H_out * W_out
    K = KH * KW * Cin

    LANE, SUB = 128, 8
    K_p = ((K + LANE - 1) // LANE) * LANE        # lane dim of w_T / sublane of patches_T
    Cout_p = ((Cout + SUB - 1) // SUB) * SUB     # sublane dim of the (Cout, M) output
    tm = max(LANE, min(tm, ((M + LANE - 1) // LANE) * LANE))
    M_p = ((M + tm - 1) // tm) * tm              # zero-padded; stats still use 1/M
    n_tiles = M_p // tm

    # ---- glue (plain JAX, tiny at this size): channel-first layout + im2col^T ----
    # NCHW -> (Cin, N, H, W) so Cin lands on the patch-row axis with no in-kernel
    # transpose; cast to bf16 BEFORE the KH*KW tap expansion (no extra cast pass
    # over the expanded patch matrix).
    xc = jnp.transpose(x_nchw, (1, 0, 2, 3)).astype(jnp.bfloat16)
    xc = jnp.pad(xc, ((0, 0), (0, 0), (padding, padding), (padding, padding)))
    taps = []
    for kh in range(KH):
        for kw in range(KW):
            t = jax.lax.slice(
                xc, (0, 0, kh, kw),
                (Cin, N, kh + (H_out - 1) * stride + 1,
                 kw + (W_out - 1) * stride + 1),
                (1, 1, stride, stride))          # (Cin, N, H_out, W_out)
            taps.append(t.reshape(Cin, M))
    patches_t = jnp.concatenate(taps, axis=0)    # (K, M), rows ordered (kh, kw, cin)
    patches_t = jnp.pad(patches_t, ((0, K_p - K), (0, M_p - M)))

    # Weight (Cout, Cin, KH, KW) -> (Cout, KH, KW, Cin) -> (Cout, K); pad; bf16.
    w_t = jnp.transpose(weight, (0, 2, 3, 1)).reshape(Cout, K).astype(jnp.bfloat16)
    w_t = jnp.pad(w_t, ((0, Cout_p - Cout), (0, K_p - K)))

    g = jnp.pad(gamma.astype(jnp.float32), (0, Cout_p - Cout)).reshape(Cout_p, 1)
    b = jnp.pad(beta.astype(jnp.float32), (0, Cout_p - Cout)).reshape(Cout_p, 1)

    kernel = functools.partial(_conv_bn_relu_kernel, eps=eps, inv_m=1.0 / M,
                               n_tiles=n_tiles, tm=tm)

    out2d = pl.pallas_call(
        kernel,
        out_shape=jax.ShapeDtypeStruct((Cout_p, M_p), jnp.bfloat16),
        grid_spec=pltpu.PrefetchScalarGridSpec(
            num_scalar_prefetch=0,
            grid=(n_tiles,),
            in_specs=[
                pl.BlockSpec((Cout_p, K_p), lambda i: (0, 0)),   # w_T (resident)
                pl.BlockSpec((K_p, tm), lambda i: (0, i)),       # patch tile (pipelined)
                pl.BlockSpec((Cout_p, 1), lambda i: (0, 0)),     # gamma
                pl.BlockSpec((Cout_p, 1), lambda i: (0, 0)),     # beta
            ],
            out_specs=pl.BlockSpec((Cout_p, M_p), lambda i: (0, 0)),  # resident output
            scratch_shapes=[
                pltpu.VMEM((n_tiles, Cout_p, tm), jnp.float32),  # pre-BN conv tiles
                pltpu.VMEM((Cout_p, 1), jnp.float32),            # per-channel sum
                pltpu.VMEM((Cout_p, 1), jnp.float32),            # per-channel sumsq
            ]),
        compiler_params=pltpu.CompilerParams(
            # Single fused pass is sequential in M (BN finalize needs all tiles).
            dimension_semantics=("arbitrary",)),
    )(w_t, patches_t, g, b)

    # Slice off channel / M padding; (Cout, M) -> NCHW is a leading-axis permute.
    out = out2d[:Cout, :M].astype(jnp.float32).reshape(Cout, N, H_out, W_out)
    return jnp.transpose(out, (1, 0, 2, 3))


def _reference(x, weight, bias, gamma, beta, *, stride, padding, eps=1e-5):
    conv = jax.lax.conv_general_dilated(
        x, weight, window_strides=(stride, stride),
        padding=[(padding, padding), (padding, padding)],
        dimension_numbers=('NCHW', 'OIHW', 'NCHW'))
    conv = conv + bias.reshape(1, -1, 1, 1)
    mean = jnp.mean(conv, axis=(0, 2, 3), keepdims=True)
    var = jnp.mean((conv - mean) ** 2, axis=(0, 2, 3), keepdims=True)
    y = (conv - mean) * jax.lax.rsqrt(var + eps)
    y = y * gamma.reshape(1, -1, 1, 1) + beta.reshape(1, -1, 1, 1)
    return jnp.maximum(y, 0.0)


if __name__ == "__main__":
    # Module config: layer(input_channel=4, output_channel=8, kernel_size=3,
    #                      stride=1, padding=1)
    input_channel, output_channel, kernel_size, stride, padding = 4, 8, 3, 1, 1
    N, H, W = 2, 16, 16

    key = jax.random.PRNGKey(0)
    kx, kw, kb = jax.random.split(key, 3)

    x = jax.random.normal(kx, (N, input_channel, H, W), dtype=jnp.float32)

    # Deterministic parameter init (shapes follow nn.Conv2d / nn.BatchNorm2d).
    weight = 0.1 * jax.random.normal(
        kw, (output_channel, input_channel, kernel_size, kernel_size),
        dtype=jnp.float32)
    bias = 0.1 * jax.random.normal(kb, (output_channel,), dtype=jnp.float32)
    gamma = jnp.ones((output_channel,), dtype=jnp.float32)   # BN weight init
    beta = jnp.zeros((output_channel,), dtype=jnp.float32)   # BN bias init

    fn = jax.jit(functools.partial(conv_bn_relu, stride=stride, padding=padding))
    out = fn(x, weight, bias, gamma, beta)
    jax.block_until_ready(out)

    assert out.shape == (N, output_channel, H, W), out.shape

    ref = _reference(x, weight, bias, gamma, beta, stride=stride, padding=padding)
    max_err = float(jnp.max(jnp.abs(out - ref)))
    assert max_err < 5e-2, f"max abs error vs reference: {max_err}"

    print("KERNEL_OK")
</pallas_src>

<mosaic_0001>
module attributes {stable_mosaic.version = 11 : i64} {
  func.func @_conv_bn_relu_kernel(%arg0: i32, %arg1: memref<8x128xbf16, #tpu.memory_space<vmem>>, %arg2: memref<128x256xbf16, #tpu.memory_space<vmem>>, %arg3: memref<8x1xf32, #tpu.memory_space<vmem>>, %arg4: memref<8x1xf32, #tpu.memory_space<vmem>>, %arg5: memref<8x512xbf16, #tpu.memory_space<vmem>>, %arg6: memref<2x8x256xf32, #tpu.memory_space<vmem>>, %arg7: memref<8x1xf32, #tpu.memory_space<vmem>>, %arg8: memref<8x1xf32, #tpu.memory_space<vmem>>) attributes {dimension_semantics = [#tpu.dimension_semantics<arbitrary>], iteration_bounds = array<i64: 2>, scalar_prefetch = 0 : i64, scratch_operands = 3 : i64, tpu.core_type = #tpu.core_type<tc>, window_params = [{pipeline_mode = #tpu.pipeline_mode<synchronous>, transform_indices = @transform_0, window_bounds = array<i64: 8, 128>}, {transform_indices = @transform_1, window_bounds = array<i64: 128, 256>}, {pipeline_mode = #tpu.pipeline_mode<synchronous>, transform_indices = @transform_2, window_bounds = array<i64: 8, 1>}, {pipeline_mode = #tpu.pipeline_mode<synchronous>, transform_indices = @transform_3, window_bounds = array<i64: 8, 1>}, {pipeline_mode = #tpu.pipeline_mode<synchronous>, transform_indices = @transform_4, window_bounds = array<i64: 8, 512>}]} {
    %c0_i32 = arith.constant 0 : i32
    %0 = arith.cmpi eq, %arg0, %c0_i32 : i32
    %1 = arith.extui %0 : i1 to i32
    %c0_i32_0 = arith.constant 0 : i32
    %2 = arith.cmpi ne, %1, %c0_i32_0 : i32
    scf.if %2 {
      %cst_17 = arith.constant 0.000000e+00 : f32
      %24 = vector.broadcast %cst_17 : f32 to vector<8x1xf32>
      %c0_18 = arith.constant 0 : index
      %c0_19 = arith.constant 0 : index
      %25 = vector.load %arg7[%c0_18, %c0_19] : memref<8x1xf32, #tpu.memory_space<vmem>>, vector<8x1xf32>
      tpu.vector_store %arg7[%c0_18, %c0_19], %24 {strides = array<i32>} : memref<8x1xf32, #tpu.memory_space<vmem>>, vector<8x1xf32>,
      %cst_20 = arith.constant 0.000000e+00 : f32
      %26 = vector.broadcast %cst_20 : f32 to vector<8x1xf32>
      %c0_21 = arith.constant 0 : index
      %c0_22 = arith.constant 0 : index
      %27 = vector.load %arg8[%c0_21, %c0_22] : memref<8x1xf32, #tpu.memory_space<vmem>>, vector<8x1xf32>
      tpu.vector_store %arg8[%c0_21, %c0_22], %26 {strides = array<i32>} : memref<8x1xf32, #tpu.memory_space<vmem>>, vector<8x1xf32>,
    } else {
    }
    %c0 = arith.constant 0 : index
    %c0_1 = arith.constant 0 : index
    %3 = vector.load %arg1[%c0, %c0_1] : memref<8x128xbf16, #tpu.memory_space<vmem>>, vector<8x128xbf16>
    %c0_2 = arith.constant 0 : index
    %c0_3 = arith.constant 0 : index
    %4 = vector.load %arg2[%c0_2, %c0_3] : memref<128x256xbf16, #tpu.memory_space<vmem>>, vector<128x256xbf16>
    %cst = arith.constant dense<0.000000e+00> : vector<8x256xf32>
    %5 = tpu.matmul %3, %4, %cst {dimension_numbers = #tpu.dot_dimension_numbers<[1], [0], [0], [1], [0, 0, 1, 1], [], []>} : vector<8x128xbf16>, vector<128x256xbf16>, vector<8x256xf32> -> vector<8x256xf32>
    %6 = arith.index_cast %arg0 : i32 to index
    %c0_4 = arith.constant 0 : index
    %c0_5 = arith.constant 0 : index
    %7 = vector.load %arg6[%6, %c0_4, %c0_5] : memref<2x8x256xf32, #tpu.memory_space<vmem>>, vector<1x8x256xf32>
    %8 = vector.shape_cast %7 : vector<1x8x256xf32> to vector<8x256xf32>
    %9 = vector.shape_cast %5 : vector<8x256xf32> to vector<1x8x256xf32>
    tpu.vector_store %arg6[%6, %c0_4, %c0_5], %9 {strides = array<i32>} : memref<2x8x256xf32, #tpu.memory_space<vmem>>, vector<1x8x256xf32>,
    %c0_6 = arith.constant 0 : index
    %c0_7 = arith.constant 0 : index
    %10 = vector.load %arg7[%c0_6, %c0_7] : memref<8x1xf32, #tpu.memory_space<vmem>>, vector<8x1xf32>
    %cst_8 = arith.constant dense<0.000000e+00> : vector<8xf32>
    %11 = vector.multi_reduction <add>, %5, %cst_8 [1] : vector<8x256xf32> to vector<8xf32>
    %12 = vector.shape_cast %11 : vector<8xf32> to vector<8x1xf32>
    %13 = arith.addf %10, %12 : vector<8x1xf32>
    %c0_9 = arith.constant 0 : index
    %c0_10 = arith.constant 0 : index
    %14 = vector.load %arg7[%c0_9, %c0_10] : memref<8x1xf32, #tpu.memory_space<vmem>>, vector<8x1xf32>
    tpu.vector_store %arg7[%c0_9, %c0_10], %13 {strides = array<i32>} : memref<8x1xf32, #tpu.memory_space<vmem>>, vector<8x1xf32>,
    %c0_11 = arith.constant 0 : index
    %c0_12 = arith.constant 0 : index
    %15 = vector.load %arg8[%c0_11, %c0_12] : memref<8x1xf32, #tpu.memory_space<vmem>>, vector<8x1xf32>
    %16 = arith.mulf %5, %5 : vector<8x256xf32>
    %cst_13 = arith.constant dense<0.000000e+00> : vector<8xf32>
    %17 = vector.multi_reduction <add>, %16, %cst_13 [1] : vector<8x256xf32> to vector<8xf32>
    %18 = vector.shape_cast %17 : vector<8xf32> to vector<8x1xf32>
    %19 = arith.addf %15, %18 : vector<8x1xf32>
    %c0_14 = arith.constant 0 : index
    %c0_15 = arith.constant 0 : index
    %20 = vector.load %arg8[%c0_14, %c0_15] : memref<8x1xf32, #tpu.memory_space<vmem>>, vector<8x1xf32>
    tpu.vector_store %arg8[%c0_14, %c0_15], %19 {strides = array<i32>} : memref<8x1xf32, #tpu.memory_space<vmem>>, vector<8x1xf32>,
    %c1_i32 = arith.constant 1 : i32
    %21 = arith.cmpi eq, %arg0, %c1_i32 : i32
    %22 = arith.extui %21 : i1 to i32
    %c0_i32_16 = arith.constant 0 : i32
    %23 = arith.cmpi ne, %22, %c0_i32_16 : i32
    scf.if %23 {
      %c0_17 = arith.constant 0 : index
      %c0_18 = arith.constant 0 : index
      %24 = vector.load %arg7[%c0_17, %c0_18] : memref<8x1xf32, #tpu.memory_space<vmem>>, vector<8x1xf32>
      %cst_19 = arith.constant 0.001953125 : f32
      %25 = vector.broadcast %cst_19 : f32 to vector<8x1xf32>
      %26 = arith.mulf %24, %25 : vector<8x1xf32>
      %c0_20 = arith.constant 0 : index
      %c0_21 = arith.constant 0 : index
      %27 = vector.load %arg8[%c0_20, %c0_21] : memref<8x1xf32, #tpu.memory_space<vmem>>, vector<8x1xf32>
      %cst_22 = arith.constant 0.001953125 : f32
      %28 = vector.broadcast %cst_22 : f32 to vector<8x1xf32>
      %29 = arith.mulf %27, %28 : vector<8x1xf32>
      %30 = arith.mulf %26, %26 : vector<8x1xf32>
      %31 = arith.subf %29, %30 : vector<8x1xf32>
      %cst_23 = arith.constant 0.000000e+00 : f32
      %32 = vector.broadcast %cst_23 : f32 to vector<8x1xf32>
      %33 = arith.maximumf %31, %32 : vector<8x1xf32>
      %c0_24 = arith.constant 0 : index
      %c0_25 = arith.constant 0 : index
      %34 = vector.load %arg3[%c0_24, %c0_25] : memref<8x1xf32, #tpu.memory_space<vmem>>, vector<8x1xf32>
      %cst_26 = arith.constant 9.99999974E-6 : f32
      %35 = vector.broadcast %cst_26 : f32 to vector<8x1xf32>
      %36 = arith.addf %33, %35 : vector<8x1xf32>
      %37 = math.rsqrt %36 : vector<8x1xf32>
      %38 = arith.mulf %34, %37 : vector<8x1xf32>
      %c0_27 = arith.constant 0 : index
      %c0_28 = arith.constant 0 : index
      %39 = vector.load %arg4[%c0_27, %c0_28] : memref<8x1xf32, #tpu.memory_space<vmem>>, vector<8x1xf32>
      %40 = arith.mulf %26, %38 : vector<8x1xf32>
      %41 = arith.subf %39, %40 : vector<8x1xf32>
      %c0_29 = arith.constant 0 : index
      %c0_30 = arith.constant 0 : index
      %c0_31 = arith.constant 0 : index
      %42 = vector.load %arg6[%c0_29, %c0_30, %c0_31] : memref<2x8x256xf32, #tpu.memory_space<vmem>>, vector<1x8x256xf32>
      %43 = vector.shape_cast %42 : vector<1x8x256xf32> to vector<8x256xf32>
      %44 = vector.broadcast %38 : vector<8x1xf32> to vector<8x256xf32>
      %45 = arith.mulf %43, %44 : vector<8x256xf32>
      %46 = vector.broadcast %41 : vector<8x1xf32> to vector<8x256xf32>
      %47 = arith.addf %45, %46 : vector<8x256xf32>
      %cst_32 = arith.constant 0.000000e+00 : f32
      %48 = vector.broadcast %cst_32 : f32 to vector<8x256xf32>
      %49 = arith.maximumf %47, %48 : vector<8x256xf32>
      %50 = arith.truncf %49 : vector<8x256xf32> to vector<8x256xbf16>
      %c0_33 = arith.constant 0 : index
      %c0_34 = arith.constant 0 : index
      %51 = vector.load %arg5[%c0_33, %c0_34] : memref<8x512xbf16, #tpu.memory_space<vmem>>, vector<8x256xbf16>
      tpu.vector_store %arg5[%c0_33, %c0_34], %50 {strides = array<i32>} : memref<8x512xbf16, #tpu.memory_space<vmem>>, vector<8x256xbf16>,
      %c1 = arith.constant 1 : index
      %c0_35 = arith.constant 0 : index
      %c0_36 = arith.constant 0 : index
      %52 = vector.load %arg6[%c1, %c0_35, %c0_36] : memref<2x8x256xf32, #tpu.memory_space<vmem>>, vector<1x8x256xf32>
      %53 = vector.shape_cast %52 : vector<1x8x256xf32> to vector<8x256xf32>
      %54 = vector.broadcast %38 : vector<8x1xf32> to vector<8x256xf32>
      %55 = arith.mulf %53, %54 : vector<8x256xf32>
      %56 = vector.broadcast %41 : vector<8x1xf32> to vector<8x256xf32>
      %57 = arith.addf %55, %56 : vector<8x256xf32>
      %cst_37 = arith.constant 0.000000e+00 : f32
      %58 = vector.broadcast %cst_37 : f32 to vector<8x256xf32>
      %59 = arith.maximumf %57, %58 : vector<8x256xf32>
      %60 = arith.truncf %59 : vector<8x256xf32> to vector<8x256xbf16>
      %c0_38 = arith.constant 0 : index
      %c256 = arith.constant 256 : index
      %61 = vector.load %arg5[%c0_38, %c256] : memref<8x512xbf16, #tpu.memory_space<vmem>>, vector<8x256xbf16>
      tpu.vector_store %arg5[%c0_38, %c256], %60 {strides = array<i32>} : memref<8x512xbf16, #tpu.memory_space<vmem>>, vector<8x256xbf16>,
    } else {
    }
    return
  }
  func.func @transform_0(%arg0: i32) -> (i32, i32) {
    %c0_i32 = arith.constant 0 : i32
    %c0_i32_0 = arith.constant 0 : i32
    %c0_i32_1 = arith.constant 0 : i32
    return %c0_i32, %c0_i32_0 : i32, i32
  }
  func.func @transform_1(%arg0: i32) -> (i32, i32) {
    %c0_i32 = arith.constant 0 : i32
    %c0_i32_0 = arith.constant 0 : i32
    return %c0_i32, %arg0 : i32, i32
  }
  func.func @transform_2(%arg0: i32) -> (i32, i32) {
    %c0_i32 = arith.constant 0 : i32
    %c0_i32_0 = arith.constant 0 : i32
    %c0_i32_1 = arith.constant 0 : i32
    return %c0_i32, %c0_i32_0 : i32, i32
  }
  func.func @transform_3(%arg0: i32) -> (i32, i32) {
    %c0_i32 = arith.constant 0 : i32
    %c0_i32_0 = arith.constant 0 : i32
    %c0_i32_1 = arith.constant 0 : i32
    return %c0_i32, %c0_i32_0 : i32, i32
  }
  func.func @transform_4(%arg0: i32) -> (i32, i32) {
    %c0_i32 = arith.constant 0 : i32
    %c0_i32_0 = arith.constant 0 : i32
    %c0_i32_1 = arith.constant 0 : i32
    return %c0_i32, %c0_i32_0 : i32, i32
  }
}

</mosaic_0001>

<bundles_post_ra>
// kernel: conv_bn_relu.1
= control target key start
LH: loop header
LB: loop body
LE: loop exit
PB: predicated region body
PF: predicated region fallthrough
CT: control target
= control target key end

     0   :  { %s687_s15 = smov 0   ;;  %s689_s16 = smov 0   ;;  %s790_s0 = inlined_call_operand.vmem [shape: bf16[8,128], index: 0, kind: input, shape index: {}]   ;;  %s791_s1 = inlined_call_operand.vmem [shape: bf16[128,512], index: 1, kind: input, shape index: {}]   ;;  %s792_s2 = inlined_call_operand.vmem [shape: f32[8,1], index: 2, kind: input, shape index: {}]   ;;  %s793_s3 = inlined_call_operand.vmem [shape: f32[8,1], index: 3, kind: input, shape index: {}]   ;;  %s794_s4 = inlined_call_operand.vmem [shape: bf16[8,512], index: 4, kind: output, shape index: {}]  }
   0x1   :  { %s691_s17 = smov 0  }
   0x2 LB: > { %s703_s18 = sadd.s32 4294967295, %s657_s17   ;;  %s706_s19 = sadd.s32 1, %s657_s17   ;;  %s657_s17 = sphi %s691_s17, %s797_s17   ;;  %s653_s16 = sphi %s689_s16, %s796_s16   ;;  %s649_s15 = sphi %s687_s15, %s795_s15  }
   0x3   : > { %s39_s20 = ssub.s32 %s657_s17, %s706_s19  ;;  %s42_s21 = sadd.s32 1, %s653_s16 }
   0x4   : > { %p40_p0 = scmp.eq.s32.totalorder %s39_s20, 0  ;;  %p49_p1 = scmp.ne.s32.totalorder %s653_s16, %s649_s15 }
   0x5   : > { %p50_p2 = scmp.eq.s32.totalorder %s657_s17, 0  ;;  %p547_p4 = scmp.ge.s32.totalorder %s657_s17, 2 }
   0x6   : > { %s715_s22 = scalar_select %p40_p0, %s653_s16, %s42_s21  }
   0x7   : > { %p51_p3 = por %p50_p2, %p49_p1  ;;  %147 = sbr.rel (%p547_p4) target bundleno = 24 (0x18), region = 28 }
   0xc   : > { %150 = sbr.rel (!%p51_p3) target bundleno = 24 (0x18), region = 32  ;;  %s152_s23 = sand.u32 (%p51_p3), 1, %s653_s16  }
   0xd   : > { %s577_s24 = sshll.u32 (%p51_p3), %s657_s17, 3  ;;  %s548_s25 = sshll.u32 (%p51_p3), %s152_s23, 7 }
   0xe   : > { %s723_s28 = scalar_lea.vmem (%p51_p3), %s791_s1, %s577_s24  ;;  %s154_s29 = scalar_lea.vmem (%p51_p3), [#allocation5], %s548_s25 }
   0xf   : > { %v216_v0 = vld [vmem:[%s723_s28] sm:$0xff] (%p51_p3)  ;;  %v218_v1 = vld [vmem:[%s723_s28 + $0x10] sm:$0xff] (%p51_p3) }
  0x10   : > { %v220_v2 = vld [vmem:[%s723_s28 + $0x20] sm:$0xff] (%p51_p3)  ;;  %217 = vst [vmem:[%s154_s29] sm:$0xff] (%p51_p3), %v216_v0  ;;  %219 = vst [vmem:[%s154_s29 + $0x8] sm:$0xff] (%p51_p3), %v218_v1  ;;  %v222_v3 = vld [vmem:[%s723_s28 + $0x30] sm:$0xff] (%p51_p3) }
  0x11   : > { %221 = vst [vmem:[%s154_s29 + $0x10] sm:$0xff] %v220_v2  ;;  %v224_v4 = vld [vmem:[%s723_s28 + $0x40] sm:$0xff]  ;;  %v226_v5 = vld [vmem:[%s723_s28 + $0x50] sm:$0xff]  ;;  %223 = vst [vmem:[%s154_s29 + $0x18] sm:$0xff] %v222_v3 }
  0x12   : > { %225 = vst [vmem:[%s154_s29 + $0x20] sm:$0xff] %v224_v4  ;;  %227 = vst [vmem:[%s154_s29 + $0x28] sm:$0xff] %v226_v5  ;;  %v228_v6 = vld [vmem:[%s723_s28 + $0x60] sm:$0xff]  ;;  %v230_v7 = vld [vmem:[%s723_s28 + $0x70] sm:$0xff] }
  0x13   : > { %v232_v8 = vld [vmem:[%s723_s28 + $0x80] sm:$0xff]  ;;  %229 = vst [vmem:[%s154_s29 + $0x30] sm:$0xff] %v228_v6  ;;  %231 = vst [vmem:[%s154_s29 + $0x38] sm:$0xff] %v230_v7  ;;  %v234_v9 = vld [vmem:[%s723_s28 + $0x90] sm:$0xff] }
  0x14   : > { %233 = vst [vmem:[%s154_s29 + $0x40] sm:$0xff] %v232_v8  ;;  %v236_v10 = vld [vmem:[%s723_s28 + $0xa0] sm:$0xff]  ;;  %v238_v11 = vld [vmem:[%s723_s28 + $0xb0] sm:$0xff]  ;;  %235 = vst [vmem:[%s154_s29 + $0x48] sm:$0xff] %v234_v9 }
  0x15   : > { %237 = vst [vmem:[%s154_s29 + $0x50] sm:$0xff] %v236_v10  ;;  %239 = vst [vmem:[%s154_s29 + $0x58] sm:$0xff] %v238_v11  ;;  %v240_v12 = vld [vmem:[%s723_s28 + $0xc0] sm:$0xff]  ;;  %v242_v13 = vld [vmem:[%s723_s28 + $0xd0] sm:$0xff] }
  0x16   : > { %v244_v14 = vld [vmem:[%s723_s28 + $0xe0] sm:$0xff]  ;;  %241 = vst [vmem:[%s154_s29 + $0x60] sm:$0xff] %v240_v12  ;;  %243 = vst [vmem:[%s154_s29 + $0x68] sm:$0xff] %v242_v13  ;;  %v246_v15 = vld [vmem:[%s723_s28 + $0xf0] sm:$0xff] }
  0x17   : > { %245 = vst [vmem:[%s154_s29 + $0x70] sm:$0xff] %v244_v14  ;;  %247 = vst [vmem:[%s154_s29 + $0x78] sm:$0xff] %v246_v15 }
  0x18 PF: > { %p551_p5 = scmp.ge.s32.totalorder %s657_s17, 1  ;;  %p252_p6 = scmp.lt.s32.totalorder %s657_s17, 3 }
  0x1a   : > { %p253_p7 = pnand %p551_p5, %p252_p6 }
  0x1b   : > { %s259_s30 = sand.u32 (!%p253_p7), 1, %s649_s15   ;;  %p553_p8 = scmp.ne.s32.totalorder (!%p253_p7), %s703_s18, 0 }
  0x1c   : > { %256 = sbr.rel (%p253_p7) target bundleno = 581 (0x245), region = 70  ;;  %s552_s5 = sshll.u32 (!%p253_p7), %s259_s30, 7 }
  0x1d   : > { %s744_s6 = scalar_lea.vmem (!%p253_p7), [#allocation5], %s552_s5 }
  0x21   : > { %284 = sbr.rel (%p553_p8) target bundleno = 40 (0x28), region = 78 }
  0x26   : > { %vm285_vm0 = vcmask 7168   ;;  %v659_v16 = vmov 0.0  }
  0x27   : > { %286 = vst.msk [vmem:[#allocation3] sm:$0xff] %vm285_vm0, %v659_v16  ;;  %287 = vst.msk [vmem:[#allocation4] sm:$0xff] %vm285_vm0, %v659_v16 }
  0x28 PF: > { %v608_v17 = vld [vmem:[%s744_s6 + $0x74] ss:$8 sps:$4 sm:$0xff]   ;;  %v610_v18 = vld [vmem:[%s744_s6 + $0x70] ss:$8 sps:$4 sm:$0xff]   ;;  %v660_v19 = vmov 0   ;;  %s578_s9 = sshll.u32 %s703_s18, 4 }
  0x29   : > { %417 = vmatprep.mubr.bf16.mxu0 %v660_v19  ;;  %385 = vmatprep.subr.bf16.mxu0 %v608_v17  ;;  %v611_v20 = vld [vmem:[%s744_s6 + $0x64] ss:$8 sps:$4 sm:$0xff]   ;;  %v613_v21 = vld [vmem:[%s744_s6 + $0x60] ss:$8 sps:$4 sm:$0xff]   ;;  %v614_v22 = vld [vmem:[%s744_s6 + $0x54] ss:$8 sps:$4 sm:$0xff]  }
  0x2a   : > { %386 = vmatpush1.bf16.msra.mxu0 %v610_v18  ;;  %v616_v23 = vld [vmem:[%s744_s6 + $0x50] ss:$8 sps:$4 sm:$0xff]   ;;  %v617_v24 = vld [vmem:[%s744_s6 + $0x44] ss:$8 sps:$4 sm:$0xff]   ;;  %v619_v25 = vld [vmem:[%s744_s6 + $0x40] ss:$8 sps:$4 sm:$0xff]  }
  0x2b   : > { %387 = vmatprep.subr.bf16.mxu0 %v611_v20  ;;  %v620_v26 = vld [vmem:[%s744_s6 + $0x34] ss:$8 sps:$4 sm:$0xff]   ;;  %v622_v27 = vld [vmem:[%s744_s6 + $0x30] ss:$8 sps:$4 sm:$0xff]   ;;  %v623_v28 = vld [vmem:[%s744_s6 + $0x24] ss:$8 sps:$4 sm:$0xff]  }
  0x2c   : > { %v625_v29 = vld [vmem:[%s744_s6 + $0x20] ss:$8 sps:$4 sm:$0xff]   ;;  %v626_v30 = vld [vmem:[%s744_s6 + $0x14] ss:$8 sps:$4 sm:$0xff]   ;;  %v628_v31 = vld [vmem:[%s744_s6 + $0x10] ss:$8 sps:$4 sm:$0xff]  }
  0x2d   : > { %v629_v32 = vld [vmem:[%s744_s6 + $0x4] ss:$8 sps:$4 sm:$0xff]   ;;  %v631_v33 = vld [vmem:[%s744_s6] ss:$8 sps:$4 sm:$0xff]   ;;  %v288_v34 = vld [vmem:[%s790_s0] sm:$0xf] }
  0x2e   : > { %388 = vmatpush1.bf16.msra.mxu0 %v613_v21  ;;  %s428_s10 = scalar_lea.vmem [#allocation2], %s578_s9  ;;  %v431_v43 = vld [vmem:[#allocation3] sm:$0xff]  ;;  %vm436_vm1 = vcmask 7168   ;;  %v438_v46 = vld [vmem:[#allocation4] sm:$0xff]  ;;  %p572_p9 = scmp.ne.s32.totalorder %s703_s18, 1 }
  0x2f   : > { %389 = vmatprep.subr.bf16.mxu0 %v614_v22 }
  0x32   : > { %390 = vmatpush1.bf16.msra.mxu0 %v616_v23 }
  0x33   : > { %391 = vmatprep.subr.bf16.mxu0 %v617_v24 }
  0x36   : > { %392 = vmatpush1.bf16.msra.mxu0 %v619_v25 }
  0x37   : > { %393 = vmatprep.subr.bf16.mxu0 %v620_v26 }
  0x3a   : > { %394 = vmatpush1.bf16.msra.mxu0 %v622_v27 }
  0x3b   : > { %395 = vmatprep.subr.bf16.mxu0 %v623_v28 }
  0x3e   : > { %396 = vmatpush1.bf16.msra.mxu0 %v625_v29 }
  0x3f   : > { %397 = vmatprep.subr.bf16.mxu0 %v626_v30 }
  0x42   : > { %398 = vmatpush1.bf16.msra.mxu0 %v628_v31 }
  0x43   : > { %399 = vmatprep.subr.bf16.mxu0 %v629_v32 }
  0x46   : > { %400 = vmatpush1.bf16.msra.mxu0 %v631_v33 }
  0x49   : > { %418 = vmatmul.mubr.bf16.vlgmr.msra.gmra.mxu0 %v288_v34 }
 0x109   : > { %v419_v35 = vpop.f32.mrf.mxu0 }
 0x10a   : > { %429 = vst [vmem:[%s428_s10] sm:$0xff] %v419_v35  ;;  %v439_v40 = vmul.f32 %v419_v35, %v419_v35 }
 0x10b   : > { %v421_v36 = vpop.f32.mrf.mxu0 }
 0x10c   : > { %430 = vst [vmem:[%s428_s10 + $0x8] sm:$0xff] %v421_v36  ;;  %v432_v37 = vadd.f32 %v421_v36, %v419_v35  ;;  %v440_v38 = vmul.f32 %v421_v36, %v421_v36 }
 0x10d   : > { %v423_v39 = vpop.f32.mrf.mxu0 }
 0x10e   : > { %433 = vadd.xlane.f32.xlu0 %v432_v37  ;;  %v441_v42 = vadd.f32 %v440_v38, %v439_v40 }
 0x10f   : > { %v424_v41 = vpop.f32.mrf.mxu0 }
 0x112   : > { %442 = vadd.xlane.f32.xlu0 %v441_v42 }
 0x197   : > { %v434_v44 = vpop.xlane.xlu0 %433 }
 0x198   : > { %v435_v45 = vadd.f32 %v434_v44, %v431_v43 }
 0x19a   : > { %437 = vst.msk [vmem:[#allocation3] sm:$0xff] %vm436_vm1, %v435_v45  ;;  %449 = sbr.rel (%p572_p9) target bundleno = 581 (0x245), region = 82 }
 0x19b   : > { %v443_v47 = vpop.xlane.xlu0 %442 }
 0x19c   : > { %v444_v48 = vadd.f32 %v443_v47, %v438_v46 }
 0x19e   : > { %445 = vst.msk [vmem:[#allocation4] sm:$0xff] %vm436_vm1, %v444_v48 }
 0x19f   : > { %v661_v51 = vmov 0   ;;  %v457_v58 = vld [vmem:[%s792_s2] sm:$0xff]  ;;  %v465_v2 = vld [vmem:[#allocation2 + $0x8] sm:$0xff]  ;;  %v492_v3 = vld [vmem:[#allocation2 + $0x10] sm:$0xff] }
 0x1a0   : > { %632 = vset.pattern.permute.xlu0 %v661_v51  ;;  %v461_v61 = vld [vmem:[%s793_s3] sm:$0xff]  ;;  %v493_v4 = vld [vmem:[#allocation2 + $0x18] sm:$0xff] }
 0x1a1   : > { %v450_v49 = vld [vmem:[#allocation3] sm:$0xff] }
 0x1a2   : > { %v451_v52 = vmul.f32 0.001953125, %v450_v49  ;;  %v464_v0 = vld [vmem:[#allocation2] sm:$0xff] }
 0x1a4   : > { %v454_v54 = vmul.f32 %v451_v52, %v451_v52 }
 0x1a5   : > { %v452_v50 = vld [vmem:[#allocation4] sm:$0xff] }
 0x1a6   : > { %v453_v53 = vmul.f32 0.001953125, %v452_v50 }
 0x1a8   : > { %v455_v55 = vsub.f32 %v453_v53, %v454_v54 }
 0x1aa   : > { %v456_v56 = vmax.f32 %v455_v55, 0.0 }
 0x1ac   : > { %v458_v57 = vadd.f32 1e-05, %v456_v56 }
 0x1ae   : > { %633 = vrsqrt.f32 %v458_v57 }
 0x1bb   : > { %v634_v59 = vpop.eup %633 }
 0x1bc   : > { %v460_v60 = vmul.f32 %v634_v59, %v457_v58 }
 0x1be   : > { %468 = vperm.xlu0 %632, %v460_v60   ;;  %v462_v62 = vmul.f32 %v460_v60, %v451_v52 }
 0x1c0   : > { %v463_v63 = vsub.f32 %v461_v61, %v462_v62 }
 0x1c2   : > { %475 = vperm.xlu0 %632, %v463_v63  }
 0x239   : > { %v469_v1 = vpop.permute.xlu0 %468 }
 0x23a   : > { %v471_v5 = vmul.f32 %v469_v1, %v464_v0  ;;  %v472_v6 = vmul.f32 %v469_v1, %v465_v2  ;;  %v494_v7 = vmul.f32 %v492_v3, %v469_v1  ;;  %v495_v8 = vmul.f32 %v493_v4, %v469_v1 }
 0x23d   : > { %v476_v9 = vpop.permute.xlu0 %475 }
 0x23e   : > { %v478_v10 = vadd.f32 %v476_v9, %v471_v5  ;;  %v479_v11 = vadd.f32 %v476_v9, %v472_v6  ;;  %v496_v12 = vadd.f32 %v494_v7, %v476_v9  ;;  %v497_v13 = vadd.f32 %v495_v8, %v476_v9 }
 0x240   : > { %v480_v14 = vmax.f32 %v478_v10, 0.0  ;;  %v481_v15 = vmax.f32 %v479_v11, 0.0  ;;  %v498_v16 = vmax.f32 %v496_v12, 0.0  ;;  %v499_v17 = vmax.f32 %v497_v13, 0.0 }
 0x242   : > { %v579_v18 = vpack.c.bf16 %v481_v15, %v480_v14  ;;  %v580_v19 = vpack.c.bf16 %v499_v17, %v498_v16 }
 0x244   : > { %490 = vst [vmem:[%s794_s4] sm:$0xff] %v579_v18  ;;  %508 = vst [vmem:[%s794_s4 + $0x8] sm:$0xff] %v580_v19 }
 0x245 PF: > { %p11_p10 = scmp.ge.s32.totalorder %s706_s19, 4   ;;  %s795_s15 = smov %s653_s16 }
 0x246   : > { %s796_s16 = smov %s715_s22  ;;  %s797_s17 = smov %s706_s19 }
 0x247   :  { %13 = sbr.rel (!%p11_p10) target bundleno = 2 (0x2), region = 115 }

</bundles_post_ra>
